<compile_context>
chip_gen: v6e
topology: v6e:2x2x1
jax: 0.10.0
libtpu: 0.0.40
codegen_flags: <defaults>
</compile_context>

<pallas_src>
import math
import functools

import jax
import jax.numpy as jnp
from jax.experimental import pallas as pl
from jax.experimental.pallas import tpu as pltpu


def _hash32(x):
    """lowbias32 integer mix: uniform 32-bit hash using only VPU ops."""
    x = x ^ (x >> 16)
    x = x * jnp.uint32(0x7FEB352D)
    x = x ^ (x >> 15)
    x = x * jnp.uint32(0x846CA68B)
    x = x ^ (x >> 16)
    return x


def _posenc_kernel(seed_ref, x_ref, pe_ref, o_ref, *, p):
    """One grid step handles a 2-D (rows, E) tile: out = dropout(x + pe)."""
    y = x_ref[...] + pe_ref[...]

    if p > 0.0:
        rows, cols = y.shape
        # Stateless counter-based RNG: hash(element index ^ hash(seed, tile)).
        seed_u = seed_ref[0].astype(jnp.uint32)
        tile_u = pl.program_id(0).astype(jnp.uint32)
        salt = _hash32(seed_u * jnp.uint32(0x9E3779B1) + tile_u + jnp.uint32(1))
        ridx = jax.lax.broadcasted_iota(jnp.int32, (rows, cols), 0)
        cidx = jax.lax.broadcasted_iota(jnp.int32, (rows, cols), 1)
        idx = (ridx * cols + cidx).astype(jnp.uint32)
        bits = _hash32(idx ^ salt)
        # Integer-domain keep test (24-bit threshold) -> no float convert / compare.
        thresh = jnp.uint32(min(int(p * float(1 << 24)), (1 << 24) - 1))
        keep = (bits >> 8) >= thresh
        y = jnp.where(keep, y * (1.0 / (1.0 - p)), jnp.zeros_like(y))

    o_ref[...] = y


def _sinusoidal_table(seq_len, emb_size, dtype):
    """(S, E) sinusoidal table, computed once in f32 then cast to the input dtype
    (matches the PyTorch module, which writes sin/cos into zeros_like(input))."""
    position = jnp.arange(seq_len, dtype=jnp.float32)[:, None]
    div_term = jnp.exp(jnp.arange(0, emb_size, 2, dtype=jnp.float32)
                       * (-math.log(10000.0) / emb_size))
    ang = position * div_term
    pe = jnp.zeros((seq_len, emb_size), jnp.float32)
    pe = pe.at[:, 0::2].set(jnp.sin(ang)).at[:, 1::2].set(jnp.cos(ang))
    return pe.astype(dtype)


def position_encoding(token_embedding, emb_size, dropout_p, seed=0,
                      max_rows_per_block=512):
    """Pallas equivalent of PositionEncoding.forward(token_embedding)."""
    B, S, E = token_embedding.shape
    assert E == emb_size and E % 2 == 0
    p = float(dropout_p)
    dtype = token_embedding.dtype
    itemsize = jnp.dtype(dtype).itemsize

    pe = _sinusoidal_table(S, E, dtype)                  # hoisted out of the kernel
    seed_arr = jnp.asarray([seed], dtype=jnp.int32)
    kernel = functools.partial(_posenc_kernel, p=p)
    cost = pl.CostEstimate(flops=B * S * E, transcendentals=0,
                           bytes_accessed=(2 * B * S * E + S * E) * itemsize)
    cparams = pltpu.CompilerParams(dimension_semantics=("parallel",))

    # Pick a row tile: largest multiple of 8 that divides S (so each row tile maps to
    # a single pe tile), capped to keep double-buffered blocks small on v7x VMEM.
    rows_tile = 0
    t = 8
    while t <= min(S, max_rows_per_block):
        if S % t == 0:
            rows_tile = t
        t += 8

    if rows_tile:
        # Flattened row-tiled path: grid over (B*S) // rows_tile independent tiles.
        seq_blocks = S // rows_tile
        n_blocks = (B * S) // rows_tile
        x2 = token_embedding.reshape(B * S, E)
        grid_spec = pltpu.PrefetchScalarGridSpec(
            num_scalar_prefetch=1,                       # seed lands in SMEM
            grid=(n_blocks,),
            in_specs=[
                pl.BlockSpec((rows_tile, E), lambda i, sd: (i, 0)),
                # pe tile for this row block; constant (=resident) when seq_blocks==1
                pl.BlockSpec((rows_tile, E), lambda i, sd: (i % seq_blocks, 0)),
            ],
            out_specs=pl.BlockSpec((rows_tile, E), lambda i, sd: (i, 0)),
        )
        out = pl.pallas_call(
            kernel,
            out_shape=jax.ShapeDtypeStruct((B * S, E), dtype),
            grid_spec=grid_spec,
            compiler_params=cparams,
            cost_estimate=cost,
        )(seed_arr, x2, pe)
        return out.reshape(B, S, E)

    # Fallback (S has no multiple-of-8 divisor): one batch element per grid step.
    # Block dims equal the full (S, E) extents, so the layout is always legal, and
    # the pe table maps to the same block every step (stays VMEM resident).
    grid_spec = pltpu.PrefetchScalarGridSpec(
        num_scalar_prefetch=1,
        grid=(B,),
        in_specs=[
            pl.BlockSpec((pl.Squeezed(), S, E), lambda b, sd: (b, 0, 0)),
            pl.BlockSpec((S, E), lambda b, sd: (0, 0)),
        ],
        out_specs=pl.BlockSpec((pl.Squeezed(), S, E), lambda b, sd: (b, 0, 0)),
    )
    return pl.pallas_call(
        kernel,
        out_shape=jax.ShapeDtypeStruct((B, S, E), dtype),
        grid_spec=grid_spec,
        compiler_params=cparams,
        cost_estimate=cost,
    )(seed_arr, token_embedding, pe)


def _reference_no_dropout(x, emb_size):
    """Pure-JAX reference of the PyTorch forward with dropout disabled (eval)."""
    B, S, E = x.shape
    return x + _sinusoidal_table(S, emb_size, jnp.float32)[None, :, :]


if __name__ == "__main__":
    key = jax.random.PRNGKey(0)
    B, S, E = 2, 8, 32
    x = jax.random.normal(key, (B, S, E), dtype=jnp.float32)

    # 1) Deterministic check: dropout p = 0.0 (identity), compare vs pure-JAX ref.
    out = position_encoding(x, emb_size=E, dropout_p=0.0)
    jax.block_until_ready(out)
    ref = _reference_no_dropout(x, E)
    assert jnp.allclose(out, ref, atol=1e-5, rtol=1e-5), "mismatch vs reference"

    # 2) Training-mode dropout: kept elements must equal (x + pe) / (1 - p),
    #    and the dropped fraction must be in a loose band around p.
    p = 0.1
    out_drop = position_encoding(x, emb_size=E, dropout_p=p, seed=0)
    jax.block_until_ready(out_drop)
    kept = out_drop != 0
    assert jnp.allclose(jnp.where(kept, out_drop, 0.0),
                        jnp.where(kept, ref / (1.0 - p), 0.0),
                        atol=1e-4, rtol=1e-4), "dropout scaling mismatch"
    frac_dropped = float(jnp.mean((~kept).astype(jnp.float32)))
    assert 0.0 <= frac_dropped < 0.35, f"dropout fraction looks wrong: {frac_dropped}"

    print("KERNEL_OK")
</pallas_src>

<mosaic_0001>
module attributes {stable_mosaic.version = 11 : i64} {
  func.func @_posenc_kernel(%arg0: i32, %arg1: memref<1xi32, #tpu.memory_space<smem>>, %arg2: memref<8x32xf32, #tpu.memory_space<vmem>>, %arg3: memref<8x32xf32, #tpu.memory_space<vmem>>, %arg4: memref<8x32xf32, #tpu.memory_space<vmem>>) attributes {dimension_semantics = [#tpu.dimension_semantics<parallel>], iteration_bounds = array<i64: 2>, scalar_prefetch = 1 : i64, scratch_operands = 0 : i64, tpu.core_type = #tpu.core_type<tc>, window_params = [{transform_indices = @transform_0, window_bounds = array<i64: 8, 32>}, {transform_indices = @transform_1, window_bounds = array<i64: 8, 32>}, {transform_indices = @transform_2, window_bounds = array<i64: 8, 32>}]} {
    %c0 = arith.constant 0 : index
    %c0_0 = arith.constant 0 : index
    %0 = vector.load %arg2[%c0, %c0_0] : memref<8x32xf32, #tpu.memory_space<vmem>>, vector<8x32xf32>
    %c0_1 = arith.constant 0 : index
    %c0_2 = arith.constant 0 : index
    %1 = vector.load %arg3[%c0_1, %c0_2] : memref<8x32xf32, #tpu.memory_space<vmem>>, vector<8x32xf32>
    %2 = arith.addf %0, %1 : vector<8x32xf32>
    %c0_3 = arith.constant 0 : index
    %c0_4 = arith.constant 0 : index
    %3 = vector.load %arg4[%c0_3, %c0_4] : memref<8x32xf32, #tpu.memory_space<vmem>>, vector<8x32xf32>
    tpu.vector_store %arg4[%c0_3, %c0_4], %2 {strides = array<i32>} : memref<8x32xf32, #tpu.memory_space<vmem>>, vector<8x32xf32>,
    return
  }
  func.func @transform_0(%arg0: i32, %arg1: memref<1xi32, #tpu.memory_space<smem>>) -> (i32, i32) {
    %c0_i32 = arith.constant 0 : i32
    %c0_i32_0 = arith.constant 0 : i32
    return %arg0, %c0_i32 : i32, i32
  }
  func.func @transform_1(%arg0: i32, %arg1: memref<1xi32, #tpu.memory_space<smem>>) -> (i32, i32) {
    %c1_i32 = arith.constant 1 : i32
    %c0_i32 = arith.constant 0 : i32
    %0 = arith.cmpi eq, %c1_i32, %c0_i32 : i32
    %c1_i32_0 = arith.constant 1 : i32
    %1 = arith.select %0, %c1_i32_0, %c1_i32 : i32
    %2 = arith.remsi %arg0, %1 : i32
    %c0_i32_1 = arith.constant 0 : i32
    %3 = arith.cmpi ne, %2, %c0_i32_1 : i32
    %c0_i32_2 = arith.constant 0 : i32
    %4 = arith.cmpi slt, %2, %c0_i32_2 : i32
    %c0_i32_3 = arith.constant 0 : i32
    %5 = arith.cmpi slt, %1, %c0_i32_3 : i32
    %6 = arith.xori %4, %5 : i1
    %7 = arith.andi %6, %3 : i1
    %8 = arith.addi %2, %1 : i32
    %9 = arith.select %7, %8, %2 : i32
    %c0_i32_4 = arith.constant 0 : i32
    %c0_i32_5 = arith.constant 0 : i32
    return %9, %c0_i32_4 : i32, i32
  }
  func.func @transform_2(%arg0: i32, %arg1: memref<1xi32, #tpu.memory_space<smem>>) -> (i32, i32) {
    %c0_i32 = arith.constant 0 : i32
    %c0_i32_0 = arith.constant 0 : i32
    return %arg0, %c0_i32 : i32, i32
  }
}

</mosaic_0001>

<bundles_post_ra>
// kernel: tpu_custom_call.1
= control target key start
LH: loop header
LB: loop body
LE: loop exit
PB: predicated region body
PF: predicated region fallthrough
CT: control target
= control target key end

     0   :  { %9 = vsyncpa [#allocation5], 0  ;;  %s657_s0 = inlined_call_operand.<no memory space> [shape: s32[1], index: 0, kind: input, shape index: {}]   ;;  %s658_s1 = inlined_call_operand.hbm [shape: f32[16,32], index: 1, kind: input, shape index: {}]   ;;  %s659_s2 = inlined_call_operand.hbm [shape: f32[8,32], index: 2, kind: input, shape index: {}]   ;;  %s660_s3 = inlined_call_operand.hbm [shape: f32[16,32], index: 3, kind: output, shape index: {}]  }
   0x1   :  { %11 = vsyncpa [#allocation5 + $0x1], 0 }
   0x2   :  { %12 = vsyncpa [#allocation8], 0 }
   0x3   :  { %13 = vsyncpa [#allocation6], 0 }
   0x4   :  { %15 = vsyncpa [#allocation6 + $0x1], 0  ;;  %s491_s12 = smov 0   ;;  %s493_s13 = smov 0  }
   0x5   :  { %s495_s14 = smov 0   ;;  %s497_s0 = smov 0  }
   0x6 LB: > { %s512_s15 = sadd.s32 4294967295, %s466_s0   ;;  %s273_s16 = sadd.s32 4294967294, %s466_s0   ;;  %s466_s0 = sphi %s497_s0, %s683_s0   ;;  %s462_s14 = sphi %s495_s14, %s682_s14   ;;  %s458_s13 = sphi %s493_s13, %s681_s13   ;;  %s454_s12 = sphi %s491_s12, %s680_s12  }
   0x7   : > { %p41_p0 = scmp.ne.s32.totalorder %s458_s13, %s454_s12  ;;  %p661_p1 = scmp.eq.s32.totalorder %s512_s15, 0 }
   0x8   : > { %p92_p3 = scmp.eq.s32.totalorder %s273_s16, 1  ;;  %p274_p5 = scmp.ge.s32.totalorder %s466_s0, 1 }
   0x9   : > { %p521_p4 = por %p661_p1, %p41_p0  ;;  %p99_p7 = scmp.lt.s32.totalorder %s466_s0, 3 }
   0xa   : > { %p526_p6 = por %p92_p3, %p41_p0  ;;  %s468_s20 = smov [#allocation7]  }
   0xb   : > { %s665_s17 = scalar_select %p521_p4, 1, 0 }
   0xc   : > { %s666_s18 = scalar_select %p526_p6, 1, 0 }
   0xd   : > { %p531_p8 = pnand %p274_p5, %p99_p7  ;;  %s112_s21 = sshll.u32 %s468_s20, 4  ;;  %s113_s21 = int_to_ptr.vmem [resolvable:$true] %s112_s21 }
   0xe   : > { %s539_s22 = sadd.s32 1, %s466_s0   ;;  %s28_s26 = sadd.s32 1, %s462_s14 }
   0xf   : > { %s667_s19 = scalar_select %p531_p8, 1, 0 }
  0x10   : > { %p295_p10 = pneg %p531_p8  ;;  %s25_s24 = ssub.s32 %s466_s0, %s539_s22 }
  0x11   : > { %p549_p12 = scmp.eq.s32.totalorder %s25_s24, 0  ;;  %p35_p13 = scmp.ne.s32.totalorder %s462_s14, %s458_s13 }
  0x12   : > { %p543_p11 = pnand %p295_p10, %p661_p1  ;;  %s355_s27 = scalar_lea.vmem %s113_s21, 128 }
  0x13   : > { %p356_p3 = scmp.ne.s32.totalorder %s113_s21, %s355_s27  ;;  %p363_p9 = scmp.lt.s32.totalorder %s113_s21, %s113_s21 }
  0x14   : > { %p346_p0 = pneg %p543_p11  ;;  %p364_p2 = scmp.lt.s32.totalorder %s355_s27, %s355_s27 }
  0x16   : > { %p358_p5 = pnand %p356_p3, %p346_p0  ;;  %p365_p10 = por %p364_p2, %p363_p9 }
  0x18   : > { %p359_p7 = pneg %p358_p5 }
  0x1a   : > { %p366_p1 = pnand %p365_p10, %p359_p7 }
  0x1c   : > { %369 = shalt.err (!%p366_p1)
}
  0x1d   : > { %298 = dma.hbm_to_vmem [thread:$0]  (!%p543_p11), %s659_s2, 128, %s113_s21, [#allocation8]  }
  0x1e   : > { %s566_s30 = scalar_select %p549_p12, %s462_s14, %s28_s26  }
  0x1f   : > { %p36_p1 = scmp.eq.s32.totalorder %s466_s0, 0  ;;  %p670_p2 = scmp.eq.s32.totalorder %s512_s15, 1 }
  0x20   : > { %p308_p0 = scmp.lt.s32.totalorder %s466_s0, 2  ;;  %s123_s5 = sand.u32 1, %s462_s14  }
  0x21   : > { %p574_p9 = por %p670_p2, %p35_p13  ;;  %p37_p3 = por %p36_p1, %p35_p13 }
  0x22   : > { %s277_s6 = sshll.u32 %s123_s5, 3  ;;  %s278_s7 = sshll.u32 %s466_s0, 7 }
  0x23   : > { %s671_s4 = scalar_select %p574_p9, 1, 0 }
  0x24   : > { %s587_s10 = scalar_lea.hbm %s658_s1, %s278_s7  ;;  %s127_s11 = scalar_lea.vmem [#allocation4], %s277_s6 }
  0x25   : > { %s134_s16 = sshll.u32 %s127_s11, 4  ;;  %p589_p11 = pnand %p308_p0, %p37_p3  ;;  %s135_s16 = int_to_ptr.vmem [resolvable:$true] %s134_s16 }
  0x26   : > { %s124_s21 = scalar_lea.sflag [#allocation5], %s123_s5  ;;  %s370_s23 = scalar_lea.hbm %s587_s10, 128 }
  0x27   : > { %p371_p12 = scmp.ne.s32.totalorder %s587_s10, %s370_s23  ;;  %p372_p13 = pneg %p589_p11 }
  0x28   : > { %s375_s26 = scalar_lea.hbm %s658_s1, 256  ;;  %p376_p10 = scmp.lt.s32.totalorder %s587_s10, %s658_s1 }
  0x29   : > { %p373_p5 = pnand %p372_p13, %p371_p12  ;;  %p377_p1 = scmp.lt.s32.totalorder %s375_s26, %s370_s23 }
  0x2b   : > { %p374_p7 = pneg %p373_p5  ;;  %p378_p2 = por %p377_p1, %p376_p10 }
  0x2d   : > { %p379_p0 = pnand %p378_p2, %p374_p7 }
  0x2f   : > { %382 = shalt.err (!%p379_p0)
}
  0x30   : > { %s383_s29 = scalar_lea.vmem %s135_s16, 128  ;;  %s469_s5 = smov [#allocation4]  }
  0x31   : > { %p384_p3 = scmp.ne.s32.totalorder %s135_s16, %s383_s29  ;;  %s388_s6 = sshll.u32 %s469_s5, 4  ;;  %s389_s6 = int_to_ptr.vmem [resolvable:$false] %s388_s6 }
  0x32   : > { %s390_s7 = scalar_lea.vmem %s389_s6, 256  ;;  %p391_p12 = scmp.lt.s32.totalorder %s135_s16, %s389_s6 }
  0x33   : > { %p386_p6 = pnand %p384_p3, %p372_p13  ;;  %p392_p5 = scmp.lt.s32.totalorder %s390_s7, %s383_s29 }
  0x35   : > { %p387_p9 = pneg %p386_p6  ;;  %p393_p4 = por %p392_p5, %p391_p12 }
  0x37   : > { %p394_p8 = pnand %p393_p4, %p387_p9 }
  0x39   : > { %397 = shalt.err (!%p394_p8)
}
  0x3a   : > { %302 = dma.hbm_to_vmem [thread:$0]  (!%p589_p11), %s587_s10, 128, %s135_s16, %s124_s21  }
  0x3b   : > { %p673_p7 = scmp.ne.s32.totalorder %s667_s19, 0 }
  0x3c   : > { %s610_s8 = sand.u32 (!%p673_p7), 1, %s458_s13   ;;  %p674_p6 = scmp.ne.s32.totalorder (!%p673_p7), %s665_s17, 0 }
  0x3d   : > { %143 = sbr.rel (%p673_p7) target bundleno = 95 (0x5f), region = 28  ;;  %s280_s9 = sshll.u32 (!%p673_p7), %s610_s8, 3 }
  0x3e   : > { %s146_s11 = scalar_lea.sflag (!%p673_p7), [#allocation5], %s610_s8  ;;  %s149_s23 = scalar_lea.vmem (!%p673_p7), [#allocation4], %s280_s9 }
  0x42   : > { %441 = dma.done.wait (%p674_p6), %s146_s11, 128  }
  0x43   : > { %443 = vsyncadd (%p674_p6), %s146_s11, 4294967168  ;;  %p675_p4 = scmp.eq.s32.totalorder %s512_s15, 0 }
  0x45   : > { %445 = dma.done.wait (%p675_p4), [#allocation8], 128   ;;  %p676_p8 = pmov %p675_p4 }
  0x46   : > { %s173_s19 = scalar_lea.vmem [#allocation9], %s280_s9  ;;  %s284_s16 = sshll.u32 %s512_s15, 7  ;;  %v174_v0 = vld [vmem:[%s149_s23] sm:$0xff]  ;;  %v175_v1 = vld [vmem:[#allocation7] sm:$0xff]  ;;  %vm177_vm0 = vcmask 261120  }
  0x47   : > { %447 = vsyncadd (%p676_p8), [#allocation8], 4294967168  ;;  %s193_s10 = sshll.u32 %s173_s19, 4  ;;  %v176_v2 = vadd.f32 %v175_v1, %v174_v0  ;;  %s191_s21 = scalar_lea.hbm %s660_s3, %s284_s16  ;;  %s194_s10 = int_to_ptr.vmem [resolvable:$true] %s193_s10 }
  0x48   : > { %s180_s24 = scalar_lea.sflag [#allocation6], %s610_s8  ;;  %s398_s25 = scalar_lea.vmem %s194_s10, 128 }
  0x49   : > { %178 = vst.msk [vmem:[%s173_s19] sm:$0xff] %vm177_vm0, %v176_v2  ;;  %p399_p9 = scmp.ne.s32.totalorder %s194_s10, %s398_s25  ;;  %p677_p11 = scmp.ne.s32.totalorder %s671_s4, 0 }
  0x4a   : > { %s470_s26 = smov [#allocation9]  }
  0x4b   : > { %p400_p13 = pnand %p399_p9, %p677_p11  ;;  %s402_s27 = sshll.u32 %s470_s26, 4  ;;  %s403_s27 = int_to_ptr.vmem [resolvable:$false] %s402_s27 }
  0x4c   : > { %s404_s15 = scalar_lea.vmem %s403_s27, 256  ;;  %p405_p1 = scmp.lt.s32.totalorder %s194_s10, %s403_s27 }
  0x4d   : > { %p401_p10 = pneg %p400_p13  ;;  %p406_p2 = scmp.lt.s32.totalorder %s404_s15, %s398_s25 }
  0x4f   : > { %p407_p0 = por %p406_p2, %p405_p1 }
  0x51   : > { %p408_p3 = pnand %p407_p0, %p401_p10 }
  0x53   : > { %411 = shalt.err (!%p408_p3)
}
  0x54   : > { %s412_s28 = scalar_lea.hbm %s191_s21, 128  ;;  %s416_s6 = scalar_lea.hbm %s660_s3, 256 }
  0x55   : > { %p413_p12 = scmp.ne.s32.totalorder %s191_s21, %s412_s28  ;;  %p417_p6 = scmp.lt.s32.totalorder %s191_s21, %s660_s3 }
  0x56   : > { %p418_p4 = scmp.lt.s32.totalorder %s416_s6, %s412_s28 }
  0x57   : > { %p414_p5 = pnand %p413_p12, %p677_p11 }
  0x58   : > { %p419_p8 = por %p418_p4, %p417_p6 }
  0x59   : > { %p415_p7 = pneg %p414_p5 }
  0x5b   : > { %p420_p9 = pnand %p419_p8, %p415_p7 }
  0x5d   : > { %423 = shalt.err (!%p420_p9)
}
  0x5e   : > { %293 = dma.vmem_to_hbm [thread:$0]  (%p677_p11), %s194_s10, 128, %s191_s21, %s180_s24  }
  0x5f PF: > { %s205_s9 = sand.u32 1, %s454_s12   ;;  %p678_p13 = scmp.ne.s32.totalorder %s666_s18, 0 }
  0x60   : > { %p679_p10 = scmp.ge.s32.totalorder %s466_s0, 2  ;;  %s206_s11 = scalar_lea.sflag [#allocation6], %s205_s9 }
  0x62   : > { %p304_p1 = pnand %p679_p10, %p678_p13 }
  0x64   : > { %p305_p2 = pneg %p304_p1 }
  0x66   : > { %449 = dma.done.wait (%p305_p2), %s206_s11, 128  }
  0x67   : > { %451 = vsyncadd (%p305_p2), %s206_s11, 4294967168  ;;  %p18_p0 = scmp.ge.s32.totalorder %s539_s22, 4   ;;  %s680_s12 = smov %s458_s13 }
  0x68   : > { %s681_s13 = smov %s462_s14  ;;  %s682_s14 = smov %s566_s30 }
  0x69   : > { %s683_s0 = smov %s539_s22  ;;  %20 = sbr.rel (!%p18_p0) target bundleno = 6 (0x6), region = 77 }
  0x6e   :  { %211 = vsyncpa [#allocation5], 1 }
  0x6f   :  { %213 = vsyncpa [#allocation5 + $0x1], 1 }
  0x70   :  { %214 = vsyncpa [#allocation8], 1 }
  0x71   :  { %215 = vsyncpa [#allocation6], 1 }
  0x72   :  { %217 = vsyncpa [#allocation6 + $0x1], 1 }

</bundles_post_ra>
